<compile_context>
chip_gen: v5e
topology: v5e:2x2
jax: 0.10.0
libtpu: 0.0.40
codegen_flags: <defaults>
</compile_context>

<pallas_src>
import jax
import jax.numpy as jnp
from jax.experimental import pallas as pl
from jax.experimental.pallas import tpu as pltpu


def _round_up(n, m):
    return ((n + m - 1) // m) * m


def pffn_kernel(x_ref, w1_ref, b1_ref, w2_ref, b2_ref, o_ref, acc_ref):
    # x_ref:  (tm, Ep)  bf16
    # w1_ref: (Ep, th)  bf16     b1_ref: (1, th) f32
    # w2_ref: (th, Ep)  bf16     b2_ref: (1, Ep) f32
    # o_ref:  (tm, Ep)  f32      acc_ref: (tm, Ep) f32 scratch
    k = pl.program_id(1)

    @pl.when(k == 0)
    def _():
        acc_ref[...] = jnp.zeros_like(acc_ref)

    # Linear1 hidden-slice + ReLU  (bf16 MXU matmul, f32 accumulate/bias/act)
    h = jnp.dot(x_ref[...], w1_ref[...], preferred_element_type=jnp.float32)
    h = jnp.maximum(h + b1_ref[...], 0.0)
    # dropout == identity (eval mode)

    # Linear2 partial product, accumulated over the H-axis grid
    acc_ref[...] += jnp.dot(
        h.astype(jnp.bfloat16), w2_ref[...], preferred_element_type=jnp.float32
    )

    @pl.when(k == pl.num_programs(1) - 1)
    def _():
        o_ref[...] = (acc_ref[...] + b2_ref[...]).astype(o_ref.dtype)


def pffn_forward(x, W1, b1, W2, b2, *, tm_target=256, th_target=512):
    """Position-wise FFN:  ReLU(x @ W1^T + b1) @ W2^T + b2  (dropout = eval mode).

    x : (B, S, E) float32
    W1: (H, E), b1: (H,)   -- PyTorch Linear1 convention
    W2: (E, H), b2: (E,)   -- PyTorch Linear2 convention
    """
    B, S, E = x.shape
    H = W1.shape[0]
    M = B * S

    # Lane-dense padding (multiples of 128) for E and H.
    Ep = _round_up(E, 128)
    Hp = _round_up(H, 128)

    # Hidden tile: largest of th_target/256/128 dividing Hp (Hp is a multiple of 128).
    th = max(t for t in (th_target, 256, 128) if Hp % t == 0)

    # Row tile: up to tm_target, multiple of 8; pad token count to a tile multiple.
    tm = min(tm_target, _round_up(M, 8))
    Mp = _round_up(M, tm)

    # Pad + cast operands.  Padded rows/cols are zero => padded lanes contribute 0.
    x2d = x.reshape(M, E)
    x_p = jnp.zeros((Mp, Ep), jnp.bfloat16).at[:M, :E].set(x2d.astype(jnp.bfloat16))
    w1_p = jnp.zeros((Ep, Hp), jnp.bfloat16).at[:E, :H].set(W1.T.astype(jnp.bfloat16))
    b1_p = jnp.zeros((1, Hp), jnp.float32).at[0, :H].set(b1.astype(jnp.float32))
    w2_p = jnp.zeros((Hp, Ep), jnp.bfloat16).at[:H, :E].set(W2.T.astype(jnp.bfloat16))
    b2_p = jnp.zeros((1, Ep), jnp.float32).at[0, :E].set(b2.astype(jnp.float32))

    cost = pl.CostEstimate(
        flops=4 * M * E * H,  # two matmuls: 2*M*E*H each
        transcendentals=0,
        bytes_accessed=(M * E * 2 + E * H * 2 + H * E * 2 + H * 4 + E * 4 + M * E * 4),
    )

    out_p = pl.pallas_call(
        pffn_kernel,
        out_shape=jax.ShapeDtypeStruct((Mp, Ep), jnp.float32),
        grid_spec=pltpu.PrefetchScalarGridSpec(
            num_scalar_prefetch=0,
            grid=(Mp // tm, Hp // th),
            in_specs=[
                pl.BlockSpec((tm, Ep), lambda i, k: (i, 0)),  # x row tile
                pl.BlockSpec((Ep, th), lambda i, k: (0, k)),  # W1^T hidden slice
                pl.BlockSpec((1, th), lambda i, k: (0, k)),   # b1 hidden slice
                pl.BlockSpec((th, Ep), lambda i, k: (k, 0)),  # W2^T hidden slice
                pl.BlockSpec((1, Ep), lambda i, k: (0, 0)),   # b2 (full)
            ],
            out_specs=pl.BlockSpec((tm, Ep), lambda i, k: (i, 0)),
            scratch_shapes=[pltpu.VMEM((tm, Ep), jnp.float32)],
        ),
        compiler_params=pltpu.CompilerParams(
            dimension_semantics=("parallel", "arbitrary"),
        ),
        cost_estimate=cost,
    )(x_p, w1_p, b1_p, w2_p, b2_p)

    return out_p[:M, :E].astype(x.dtype).reshape(B, S, E)


def xavier_uniform(key, out_dim, in_dim, dtype=jnp.float32):
    # matches nn.init.xavier_uniform_ for a (out_dim, in_dim) Linear weight
    bound = (6.0 / (in_dim + out_dim)) ** 0.5
    return jax.random.uniform(key, (out_dim, in_dim), dtype, -bound, bound)


if __name__ == "__main__":
    # Small shapes consistent with the module: batch=2, seq=8, embedding_dim=32
    B, S, E = 2, 8, 32
    expansion_factor = 4
    H = expansion_factor * E  # 128

    key = jax.random.PRNGKey(0)
    kx, kw1, kw2 = jax.random.split(key, 3)

    x = jax.random.normal(kx, (B, S, E), dtype=jnp.float32)

    # PyTorch-convention weights (out, in), xavier uniform; zero biases.
    W1 = xavier_uniform(kw1, H, E)   # Linear1.weight: (H, E)
    b1 = jnp.zeros((H,), jnp.float32)
    W2 = xavier_uniform(kw2, E, H)   # Linear2.weight: (E, H)
    b2 = jnp.zeros((E,), jnp.float32)

    out = pffn_forward(x, W1, b1, W2, b2)
    out = jax.block_until_ready(out)
    assert out.shape == (B, S, E)

    # Reference (bf16-matmul / f32-accumulate, matching the kernel's numerics;
    # dropout == identity in eval mode).
    x2d = x.reshape(B * S, E)
    ref = jnp.dot(x2d.astype(jnp.bfloat16), W1.T.astype(jnp.bfloat16),
                  preferred_element_type=jnp.float32) + b1
    ref = jnp.maximum(ref, 0.0)
    ref = jnp.dot(ref.astype(jnp.bfloat16), W2.T.astype(jnp.bfloat16),
                  preferred_element_type=jnp.float32) + b2
    ref = ref.reshape(B, S, E)

    assert jnp.allclose(out, ref, atol=1e-2, rtol=1e-2), "mismatch vs reference"

    print("KERNEL_OK")
</pallas_src>

<mosaic_0001>
module attributes {stable_mosaic.version = 11 : i64} {
  func.func @pffn_kernel(%arg0: i32, %arg1: i32, %arg2: memref<16x128xbf16, #tpu.memory_space<vmem>>, %arg3: memref<128x128xbf16, #tpu.memory_space<vmem>>, %arg4: memref<1x128xf32, #tpu.memory_space<vmem>>, %arg5: memref<128x128xbf16, #tpu.memory_space<vmem>>, %arg6: memref<1x128xf32, #tpu.memory_space<vmem>>, %arg7: memref<16x128xf32, #tpu.memory_space<vmem>>, %arg8: memref<16x128xf32, #tpu.memory_space<vmem>>) attributes {dimension_semantics = [#tpu.dimension_semantics<parallel>, #tpu.dimension_semantics<arbitrary>], iteration_bounds = array<i64: 1, 1>, scalar_prefetch = 0 : i64, scratch_operands = 1 : i64, tpu.core_type = #tpu.core_type<tc>, window_params = [{transform_indices = @transform_0, window_bounds = array<i64: 16, 128>}, {transform_indices = @transform_1, window_bounds = array<i64: 128, 128>}, {transform_indices = @transform_2, window_bounds = array<i64: 1, 128>}, {transform_indices = @transform_3, window_bounds = array<i64: 128, 128>}, {pipeline_mode = #tpu.pipeline_mode<synchronous>, transform_indices = @transform_4, window_bounds = array<i64: 1, 128>}, {transform_indices = @transform_5, window_bounds = array<i64: 16, 128>}]} {
    %c0_i32 = arith.constant 0 : i32
    %0 = arith.cmpi eq, %arg1, %c0_i32 : i32
    %1 = arith.extui %0 : i1 to i32
    %c0_i32_0 = arith.constant 0 : i32
    %2 = arith.cmpi ne, %1, %c0_i32_0 : i32
    scf.if %2 {
      %cst_16 = arith.constant 0.000000e+00 : f32
      %20 = vector.broadcast %cst_16 : f32 to vector<16x128xf32>
      %c0_17 = arith.constant 0 : index
      %c0_18 = arith.constant 0 : index
      %21 = vector.load %arg8[%c0_17, %c0_18] : memref<16x128xf32, #tpu.memory_space<vmem>>, vector<16x128xf32>
      tpu.vector_store %arg8[%c0_17, %c0_18], %20 {strides = array<i32>} : memref<16x128xf32, #tpu.memory_space<vmem>>, vector<16x128xf32>,
    } else {
    }
    %c0 = arith.constant 0 : index
    %c0_1 = arith.constant 0 : index
    %3 = vector.load %arg2[%c0, %c0_1] : memref<16x128xbf16, #tpu.memory_space<vmem>>, vector<16x128xbf16>
    %c0_2 = arith.constant 0 : index
    %c0_3 = arith.constant 0 : index
    %4 = vector.load %arg3[%c0_2, %c0_3] : memref<128x128xbf16, #tpu.memory_space<vmem>>, vector<128x128xbf16>
    %cst = arith.constant dense<0.000000e+00> : vector<16x128xf32>
    %5 = tpu.matmul %3, %4, %cst {dimension_numbers = #tpu.dot_dimension_numbers<[1], [0], [0], [1], [0, 0, 1, 1], [], []>} : vector<16x128xbf16>, vector<128x128xbf16>, vector<16x128xf32> -> vector<16x128xf32>
    %c0_4 = arith.constant 0 : index
    %c0_5 = arith.constant 0 : index
    %6 = vector.load %arg4[%c0_4, %c0_5] : memref<1x128xf32, #tpu.memory_space<vmem>>, vector<1x128xf32>
    %7 = vector.broadcast %6 : vector<1x128xf32> to vector<16x128xf32>
    %8 = arith.addf %5, %7 : vector<16x128xf32>
    %cst_6 = arith.constant 0.000000e+00 : f32
    %9 = vector.broadcast %cst_6 : f32 to vector<16x128xf32>
    %10 = arith.maximumf %8, %9 : vector<16x128xf32>
    %c0_7 = arith.constant 0 : index
    %c0_8 = arith.constant 0 : index
    %11 = vector.load %arg8[%c0_7, %c0_8] : memref<16x128xf32, #tpu.memory_space<vmem>>, vector<16x128xf32>
    %12 = arith.truncf %10 : vector<16x128xf32> to vector<16x128xbf16>
    %c0_9 = arith.constant 0 : index
    %c0_10 = arith.constant 0 : index
    %13 = vector.load %arg5[%c0_9, %c0_10] : memref<128x128xbf16, #tpu.memory_space<vmem>>, vector<128x128xbf16>
    %cst_11 = arith.constant dense<0.000000e+00> : vector<16x128xf32>
    %14 = tpu.matmul %12, %13, %cst_11 {dimension_numbers = #tpu.dot_dimension_numbers<[1], [0], [0], [1], [0, 0, 1, 1], [], []>} : vector<16x128xbf16>, vector<128x128xbf16>, vector<16x128xf32> -> vector<16x128xf32>
    %15 = arith.addf %11, %14 : vector<16x128xf32>
    %c0_12 = arith.constant 0 : index
    %c0_13 = arith.constant 0 : index
    %16 = vector.load %arg8[%c0_12, %c0_13] : memref<16x128xf32, #tpu.memory_space<vmem>>, vector<16x128xf32>
    tpu.vector_store %arg8[%c0_12, %c0_13], %15 {strides = array<i32>} : memref<16x128xf32, #tpu.memory_space<vmem>>, vector<16x128xf32>,
    %c0_i32_14 = arith.constant 0 : i32
    %17 = arith.cmpi eq, %arg1, %c0_i32_14 : i32
    %18 = arith.extui %17 : i1 to i32
    %c0_i32_15 = arith.constant 0 : i32
    %19 = arith.cmpi ne, %18, %c0_i32_15 : i32
    scf.if %19 {
      %c0_16 = arith.constant 0 : index
      %c0_17 = arith.constant 0 : index
      %20 = vector.load %arg8[%c0_16, %c0_17] : memref<16x128xf32, #tpu.memory_space<vmem>>, vector<16x128xf32>
      %c0_18 = arith.constant 0 : index
      %c0_19 = arith.constant 0 : index
      %21 = vector.load %arg6[%c0_18, %c0_19] : memref<1x128xf32, #tpu.memory_space<vmem>>, vector<1x128xf32>
      %22 = vector.broadcast %21 : vector<1x128xf32> to vector<16x128xf32>
      %23 = arith.addf %20, %22 : vector<16x128xf32>
      %c0_20 = arith.constant 0 : index
      %c0_21 = arith.constant 0 : index
      %24 = vector.load %arg7[%c0_20, %c0_21] : memref<16x128xf32, #tpu.memory_space<vmem>>, vector<16x128xf32>
      tpu.vector_store %arg7[%c0_20, %c0_21], %23 {strides = array<i32>} : memref<16x128xf32, #tpu.memory_space<vmem>>, vector<16x128xf32>,
    } else {
    }
    return
  }
  func.func @transform_0(%arg0: i32, %arg1: i32) -> (i32, i32) {
    %c0_i32 = arith.constant 0 : i32
    %c0_i32_0 = arith.constant 0 : i32
    return %arg0, %c0_i32 : i32, i32
  }
  func.func @transform_1(%arg0: i32, %arg1: i32) -> (i32, i32) {
    %c0_i32 = arith.constant 0 : i32
    %c0_i32_0 = arith.constant 0 : i32
    return %c0_i32, %arg1 : i32, i32
  }
  func.func @transform_2(%arg0: i32, %arg1: i32) -> (i32, i32) {
    %c0_i32 = arith.constant 0 : i32
    %c0_i32_0 = arith.constant 0 : i32
    return %c0_i32, %arg1 : i32, i32
  }
  func.func @transform_3(%arg0: i32, %arg1: i32) -> (i32, i32) {
    %c0_i32 = arith.constant 0 : i32
    %c0_i32_0 = arith.constant 0 : i32
    return %arg1, %c0_i32 : i32, i32
  }
  func.func @transform_4(%arg0: i32, %arg1: i32) -> (i32, i32) {
    %c0_i32 = arith.constant 0 : i32
    %c0_i32_0 = arith.constant 0 : i32
    %c0_i32_1 = arith.constant 0 : i32
    return %c0_i32, %c0_i32_0 : i32, i32
  }
  func.func @transform_5(%arg0: i32, %arg1: i32) -> (i32, i32) {
    %c0_i32 = arith.constant 0 : i32
    %c0_i32_0 = arith.constant 0 : i32
    return %arg0, %c0_i32 : i32, i32
  }
}

</mosaic_0001>

<bundles_post_ra>
// kernel: tpu_custom_call.1
= control target key start
LH: loop header
LB: loop body
LE: loop exit
PB: predicated region body
PF: predicated region fallthrough
CT: control target
= control target key end

     0   :  { %10 = vsyncpa [#allocation4], 0  ;;  %s537_s0 = inlined_call_operand.hbm [shape: bf16[16,128], index: 0, kind: input, shape index: {}]   ;;  %s538_s1 = inlined_call_operand.hbm [shape: bf16[128,128], index: 1, kind: input, shape index: {}]   ;;  %s539_s2 = inlined_call_operand.vmem [shape: f32[1,128], index: 2, kind: input, shape index: {}]   ;;  %s540_s3 = inlined_call_operand.hbm [shape: bf16[128,128], index: 3, kind: input, shape index: {}]   ;;  %s541_s4 = inlined_call_operand.vmem [shape: f32[1,128], index: 4, kind: input, shape index: {}]   ;;  %s542_s5 = inlined_call_operand.hbm [shape: f32[16,128], index: 5, kind: output, shape index: {}]  }
   0x1   :  { %11 = vsyncpa [#allocation7], 0 }
   0x2   :  { %12 = vsyncpa [#allocation5], 0  ;;  %s30_s20 = sshll.u32 %s538_s1, 4  ;;  %s481_s21 = smov [#allocation6]   ;;  %s31_s20 = int_to_ptr.hbm [resolvable:$true] %s30_s20 }
   0x3   :  { %s32_s22 = sshll.u32 %s481_s21, 4  ;;  %s17_s25 = sshll.u32 %s537_s0, 4  ;;  %s33_s22 = int_to_ptr.vmem [resolvable:$true] %s32_s22  ;;  %s18_s25 = int_to_ptr.hbm [resolvable:$true] %s17_s25 }
   0x4   :  { %s482_s26 = smov 64   ;;  %s483_s27 = smov 4  }
   0x5   :  { %38 = dma.hbm_to_vmem [thread:$0]  %s31_s20, 1024, %s33_s22, [#allocation7], %s482_s26, %s482_s26, %s483_s27  }
   0x6   :  { %s484_s28 = smov [#allocation3]   ;;  %s45_s7 = sshll.u32 %s540_s3, 4  ;;  %s46_s7 = int_to_ptr.hbm [resolvable:$true] %s45_s7 }
   0x7   :  { %s19_s29 = sshll.u32 %s484_s28, 4  ;;  %s485_s1 = smov [#allocation8]   ;;  %s20_s29 = int_to_ptr.vmem [resolvable:$true] %s19_s29 }
   0x8   :  { %25 = dma.hbm_to_vmem [thread:$0]  %s18_s25, 128, %s20_s29, [#allocation4], %s482_s26, %s482_s26, %s483_s27  }
   0x9   :  { %s47_s8 = sshll.u32 %s485_s1, 4  ;;  %s48_s8 = int_to_ptr.vmem [resolvable:$true] %s47_s8 }
   0xa   :  { %53 = dma.hbm_to_vmem [thread:$0]  %s46_s7, 1024, %s48_s8, [#allocation7], %s482_s26, %s482_s26, %s483_s27  }
   0xb   :  { %475 = dma.done.wait [#allocation4], 128  }
   0xc   :  { %476 = vsyncadd [#allocation4], 4294967168 }
   0xd   :  { %477 = dma.done.wait [#allocation7], 2048  }
   0xe   :  { %478 = vsyncadd [#allocation7], 4294965248  ;;  %v360_v0 = vld [vmem:[#allocation6 + $0x38] sm:$0xff]  ;;  %v359_v1 = vld [vmem:[#allocation6 + $0x30] sm:$0xff]  ;;  %s486_s11 = smov [#allocation9]   ;;  %s487_s15 = smov 128  }
   0xf   :  { %150 = vmatpush.bf16.msra.mxu0 %v360_v0  ;;  %v368_v2 = vld [vmem:[#allocation8 + $0x38] sm:$0xff]  ;;  %v367_v3 = vld [vmem:[#allocation8 + $0x30] sm:$0xff]  ;;  %v358_v4 = vld [vmem:[#allocation6 + $0x28] sm:$0xff]  ;;  %s268_s12 = sshll.u32 %s486_s11, 4  ;;  %s488_s16 = smov 8   ;;  %s269_s12 = int_to_ptr.vmem [resolvable:$true] %s268_s12 }
  0x10   :  { %233 = vmatpush.bf16.msra.mxu1 %v368_v2  ;;  %v366_v5 = vld [vmem:[#allocation8 + $0x28] sm:$0xff]  ;;  %v357_v6 = vld [vmem:[#allocation6 + $0x20] sm:$0xff]  ;;  %v356_v8 = vld [vmem:[#allocation6 + $0x18] sm:$0xff] }
  0x11   :  { %v365_v7 = vld [vmem:[#allocation8 + $0x20] sm:$0xff]  ;;  %v355_v9 = vld [vmem:[#allocation6 + $0x10] sm:$0xff]  ;;  %v354_v10 = vld [vmem:[#allocation6 + $0x8] sm:$0xff] }
  0x12   :  { %v353_v11 = vld [vmem:[#allocation6] sm:$0xff]  ;;  %v352_v12 = vld [vmem:[#allocation3] sm:$0xff]  ;;  %v363_v14 = vld [vmem:[#allocation8 + $0x10] sm:$0xff] }
  0x13   :  { %151 = vmatpush.bf16.msra.mxu0 %v359_v1  ;;  %v364_v13 = vld [vmem:[#allocation8 + $0x18] sm:$0xff]  ;;  %v362_v15 = vld [vmem:[#allocation8 + $0x8] sm:$0xff]  ;;  %v361_v16 = vld [vmem:[#allocation8] sm:$0xff] }
  0x14   :  { %234 = vmatpush.bf16.msra.mxu1 %v367_v3  ;;  %v377_v18 = vld [vmem:[%s539_s2] ss:$0 sm:$0xff]  ;;  %s270_s2 = sshll.u32 %s542_s5, 4  ;;  %s271_s2 = int_to_ptr.hbm [resolvable:$true] %s270_s2 }
  0x15   :  { %v378_v25 = vld [vmem:[%s541_s4] ss:$0 sm:$0xff] }
  0x17   :  { %152 = vmatpush.bf16.msra.mxu0 %v358_v4 }
  0x18   :  { %235 = vmatpush.bf16.msra.mxu1 %v366_v5 }
  0x1b   :  { %153 = vmatpush.bf16.msra.mxu0 %v357_v6 }
  0x1c   :  { %236 = vmatpush.bf16.msra.mxu1 %v365_v7 }
  0x1f   :  { %154 = vmatpush.bf16.msra.mxu0 %v356_v8 }
  0x20   :  { %237 = vmatpush.bf16.msra.mxu1 %v364_v13 }
  0x23   :  { %155 = vmatpush.bf16.msra.mxu0 %v355_v9 }
  0x24   :  { %238 = vmatpush.bf16.msra.mxu1 %v363_v14 }
  0x27   :  { %156 = vmatpush.bf16.msra.mxu0 %v354_v10 }
  0x28   :  { %239 = vmatpush.bf16.msra.mxu1 %v362_v15 }
  0x2b   :  { %157 = vmatpush.bf16.msra.mxu0 %v353_v11 }
  0x2c   :  { %240 = vmatpush.bf16.msra.mxu1 %v361_v16 }
  0x2e   :  { %158 = vmatmul.bf16.vlgmr.msra.gmra.mxu0 %v352_v12 }
  0xab   :  { %v159_v17 = vpop.f32.mrf.mxu0 }
  0xac   :  { %v160_v19 = vadd.f32 %v377_v18, %v159_v17 }
  0xae   :  { %v164_v22 = vmax.f32 %v160_v19, 0.0 }
  0xb3   :  { %v161_v20 = vpop.f32.mrf.mxu0 }
  0xb4   :  { %v162_v21 = vadd.f32 %v377_v18, %v161_v20 }
  0xb6   :  { %v165_v23 = vmax.f32 %v162_v21, 0.0 }
  0xb8   :  { %v168_v24 = vpack.c.bf16 %v165_v23, %v164_v22 }
  0xba   :  { %241 = vmatmul.bf16.vlgmr.msra.gmra.mxu1 %v168_v24 }
 0x137   :  { %v242_v26 = vpop.f32.mrf.mxu1 }
 0x138   :  { %v260_v27 = vadd.f32 %v378_v25, %v242_v26 }
 0x13a   :  { %262 = vst [vmem:[#allocation9] sm:$0xff] %v260_v27 }
 0x13f   :  { %v244_v28 = vpop.f32.mrf.mxu1 }
 0x140   :  { %v261_v29 = vadd.f32 %v378_v25, %v244_v28 }
 0x142   :  { %263 = vst [vmem:[#allocation9 + $0x8] sm:$0xff] %v261_v29 }
 0x143   :  { %276 = dma.vmem_to_hbm [thread:$0]  %s269_s12, 256, %s271_s2, [#allocation5], %s487_s15, %s487_s15, %s488_s16  }
 0x144   :  { %479 = dma.done.wait [#allocation5], 256  }
 0x145   :  { %480 = vsyncadd [#allocation5], 4294967040 }
 0x146   :  { %281 = vsyncpa [#allocation4], 1 }
 0x147   :  { %282 = vsyncpa [#allocation7], 1 }
 0x148   :  { %283 = vsyncpa [#allocation5], 1 }

</bundles_post_ra>
